<compile_context>
chip_gen: v6e
topology: v6e:2x2x1
jax: 0.10.0
libtpu: 0.0.40
codegen_flags: <defaults>
</compile_context>

<pallas_src>
import functools

import jax
import jax.numpy as jnp
from jax.experimental import pallas as pl
from jax.experimental.pallas import tpu as pltpu


def _cross_attention_kernel(x_ref, q_ref, wk_ref, wv_ref, wo_ref, bo_ref,
                            s_ref, st_ref, o_ref, *, heads, dim_head):
    inner = heads * dim_head
    BB = q_ref.shape[0]
    N = x_ref.shape[0] // BB

    xf = x_ref[...]                                        # (BB*N, D), compute dtype

    # Projections for the whole batch block at once (tall MXU matmuls, f32 acc).
    k = jnp.dot(xf, wk_ref[...], preferred_element_type=jnp.float32)   # (BB*N, I)
    v = jnp.dot(xf, wv_ref[...], preferred_element_type=jnp.float32)   # (BB*N, I)

    q = q_ref[...].astype(jnp.float32)                     # (BB, I), scale pre-folded

    k3 = k.reshape(BB, N, inner)
    v3 = v.reshape(BB, N, inner)

    # dots[b, n, h] = sum_d q[b, h*dh + d] * k[b, n, h*dh + d]
    prod = k3 * q[:, None, :]                              # (BB, N, I)
    dots = jnp.dot(prod.reshape(BB * N, inner), s_ref[...],
                   preferred_element_type=jnp.float32).reshape(BB, N, heads)

    # Softmax over key tokens (axis=1), per batch & head, in f32.
    m = jnp.max(dots, axis=1, keepdims=True)               # (BB, 1, H)
    e = jnp.exp(dots - m)                                  # (BB, N, H)
    denom = jnp.sum(e, axis=1, keepdims=True)              # (BB, 1, H)
    attn = e * pl.reciprocal(denom, approx=True)           # (BB, N, H)

    # out[b, j] = sum_n attn[b, n, head(j)] * v[b, n, j]
    attn_full = jnp.dot(attn.reshape(BB * N, heads), st_ref[...],
                        preferred_element_type=jnp.float32).reshape(BB, N, inner)
    out_vec = jnp.sum(attn_full * v3, axis=1)              # (BB, I)

    # to_out: Linear(inner -> dim) with bias (Dropout = identity in eval mode).
    y = jnp.dot(out_vec.astype(wo_ref.dtype), wo_ref[...],
                preferred_element_type=jnp.float32) + bo_ref[...]
    o_ref[...] = y.astype(o_ref.dtype)                     # lane-dense (BB, D) store


def cross_attention(x, wq, wk, wv, wo, bo, *, heads, dim_head,
                    block_b=128, compute_dtype=jnp.float32):
    """x: (B, N, D); weights stored as (in, out); bo: (1, D). Returns (B, 1, D)."""
    B, N, D = x.shape
    inner = heads * dim_head
    scale = dim_head ** -0.5

    # Hoisted query projection for all batches (scale folded into the weight);
    # this removes Wq and an M=1 matmul from the per-step kernel body.
    q_all = jnp.dot(x[:, 0, :], wq * scale)                # (B, I)

    # Batch blocking (pad B up to a multiple of the block).
    BB = B if B <= block_b else block_b
    Bp = -(-B // BB) * BB
    if Bp != B:
        pad = Bp - B
        x = jnp.concatenate([x, jnp.zeros((pad, N, D), x.dtype)], axis=0)
        q_all = jnp.concatenate(
            [q_all, jnp.zeros((pad, inner), q_all.dtype)], axis=0)

    # Loop-invariant head-sum matrices: S[j, h] = 1 iff j // dim_head == h.
    head_of = jnp.arange(inner, dtype=jnp.int32) // dim_head
    S = (head_of[:, None] == jnp.arange(heads, dtype=jnp.int32)[None, :]
         ).astype(jnp.float32)                             # (I, H)
    S_t = S.T                                              # (H, I)

    x_flat = x.reshape(Bp * N, D).astype(compute_dtype)
    q_c = q_all.astype(compute_dtype)
    wk_c = wk.astype(compute_dtype)
    wv_c = wv.astype(compute_dtype)
    wo_c = wo.astype(compute_dtype)
    bo_f = bo.astype(jnp.float32)

    kernel = functools.partial(_cross_attention_kernel,
                               heads=heads, dim_head=dim_head)

    out2d = pl.pallas_call(
        kernel,
        out_shape=jax.ShapeDtypeStruct((Bp, D), jnp.float32),
        grid=(Bp // BB,),
        in_specs=[
            pl.BlockSpec((BB * N, D), lambda i: (i, 0)),       # x (batch-flattened)
            pl.BlockSpec((BB, inner), lambda i: (i, 0)),       # q (pre-projected+scaled)
            pl.BlockSpec((D, inner), lambda i: (0, 0)),        # Wk  (loop-invariant)
            pl.BlockSpec((D, inner), lambda i: (0, 0)),        # Wv  (loop-invariant)
            pl.BlockSpec((inner, D), lambda i: (0, 0)),        # Wout
            pl.BlockSpec((1, D), lambda i: (0, 0)),            # b_out
            pl.BlockSpec((inner, heads), lambda i: (0, 0)),    # S   (head-sum)
            pl.BlockSpec((heads, inner), lambda i: (0, 0)),    # S^T
        ],
        out_specs=pl.BlockSpec((BB, D), lambda i: (i, 0)),
        compiler_params=pltpu.CompilerParams(
            dimension_semantics=("parallel",)),
        # Note for v7x (64 MiB VMEM): for ViT-sized D, consider single-buffering
        # the loop-invariant weight specs and/or raising vmem_limit_bytes.
    )(x_flat, q_c, wk_c, wv_c, wo_c, bo_f, S, S_t)

    return out2d[:B].reshape(B, 1, D)


def cross_attention_ref(x, wq, wk, wv, wo, bo, *, heads, dim_head):
    """Plain-JAX reference mirroring the PyTorch forward."""
    B, N, D = x.shape
    scale = dim_head ** -0.5
    k = jnp.einsum('bnd,de->bne', x, wk).reshape(B, N, heads, dim_head).transpose(0, 2, 1, 3)
    v = jnp.einsum('bnd,de->bne', x, wv).reshape(B, N, heads, dim_head).transpose(0, 2, 1, 3)
    q = jnp.einsum('bnd,de->bne', x[:, 0:1], wq).reshape(B, 1, heads, dim_head).transpose(0, 2, 1, 3)
    dots = jnp.einsum('bhid,bhjd->bhij', q, k) * scale
    attn = jax.nn.softmax(dots, axis=-1)
    out = jnp.einsum('bhij,bhjd->bhid', attn, v)
    out = out.transpose(0, 2, 1, 3).reshape(B, 1, heads * dim_head)
    return jnp.einsum('bne,ed->bnd', out, wo) + bo


if __name__ == "__main__":
    # Small, MXU/VPU-friendly sizes consistent with the module.
    B, N, D = 2, 8, 32
    HEADS, DIM_HEAD = 4, 8
    INNER = HEADS * DIM_HEAD

    key = jax.random.PRNGKey(0)
    kx, kq, kk, kv, ko, kb = jax.random.split(key, 6)
    x = jax.random.normal(kx, (B, N, D), dtype=jnp.float32)
    # nn.Linear weights are (out, in); we store the (in, out) transposed form
    # so y = x @ W (+ b), the same linear map.
    wq = jax.random.normal(kq, (D, INNER), dtype=jnp.float32) * 0.1
    wk = jax.random.normal(kk, (D, INNER), dtype=jnp.float32) * 0.1
    wv = jax.random.normal(kv, (D, INNER), dtype=jnp.float32) * 0.1
    wo = jax.random.normal(ko, (INNER, D), dtype=jnp.float32) * 0.1
    bo = jax.random.normal(kb, (1, D), dtype=jnp.float32) * 0.1

    ref = cross_attention_ref(x, wq, wk, wv, wo, bo, heads=HEADS, dim_head=DIM_HEAD)

    # f32 path (default compute dtype).
    out = jax.block_until_ready(
        cross_attention(x, wq, wk, wv, wo, bo, heads=HEADS, dim_head=DIM_HEAD))
    assert out.shape == (B, 1, D), out.shape
    assert jnp.allclose(out, ref, atol=1e-3, rtol=1e-3), \
        float(jnp.max(jnp.abs(out - ref)))

    # Batch-blocked path with grid > 1 and batch padding (B=20, BB=8 -> 3 steps).
    B2 = 20
    x2 = jax.random.normal(jax.random.PRNGKey(1), (B2, N, D), dtype=jnp.float32)
    out2 = jax.block_until_ready(
        cross_attention(x2, wq, wk, wv, wo, bo, heads=HEADS, dim_head=DIM_HEAD,
                        block_b=8))
    ref2 = cross_attention_ref(x2, wq, wk, wv, wo, bo, heads=HEADS, dim_head=DIM_HEAD)
    assert out2.shape == (B2, 1, D), out2.shape
    assert jnp.allclose(out2, ref2, atol=1e-3, rtol=1e-3), \
        float(jnp.max(jnp.abs(out2 - ref2)))

    # bf16 MXU path (recommended on v6e / v7x); f32 accumulation, looser tol.
    out_bf16 = jax.block_until_ready(
        cross_attention(x, wq, wk, wv, wo, bo, heads=HEADS, dim_head=DIM_HEAD,
                        compute_dtype=jnp.bfloat16))
    assert jnp.allclose(out_bf16, ref, atol=5e-2, rtol=5e-2), \
        float(jnp.max(jnp.abs(out_bf16 - ref)))

    print("KERNEL_OK")
</pallas_src>

<mosaic_0001>
module attributes {stable_mosaic.version = 11 : i64} {
  func.func @_cross_attention_kernel(%arg0: i32, %arg1: memref<16x32xf32, #tpu.memory_space<vmem>>, %arg2: memref<2x32xf32, #tpu.memory_space<vmem>>, %arg3: memref<32x32xf32, #tpu.memory_space<vmem>>, %arg4: memref<32x32xf32, #tpu.memory_space<vmem>>, %arg5: memref<32x32xf32, #tpu.memory_space<vmem>>, %arg6: memref<1x32xf32, #tpu.memory_space<vmem>>, %arg7: memref<32x4xf32, #tpu.memory_space<vmem>>, %arg8: memref<4x32xf32, #tpu.memory_space<vmem>>, %arg9: memref<2x32xf32, #tpu.memory_space<vmem>>) attributes {dimension_semantics = [#tpu.dimension_semantics<parallel>], iteration_bounds = array<i64: 1>, scalar_prefetch = 0 : i64, scratch_operands = 0 : i64, tpu.core_type = #tpu.core_type<tc>, window_params = [{transform_indices = @transform_0, window_bounds = array<i64: 16, 32>}, {transform_indices = @transform_1, window_bounds = array<i64: 2, 32>}, {pipeline_mode = #tpu.pipeline_mode<synchronous>, transform_indices = @transform_2, window_bounds = array<i64: 32, 32>}, {pipeline_mode = #tpu.pipeline_mode<synchronous>, transform_indices = @transform_3, window_bounds = array<i64: 32, 32>}, {pipeline_mode = #tpu.pipeline_mode<synchronous>, transform_indices = @transform_4, window_bounds = array<i64: 32, 32>}, {pipeline_mode = #tpu.pipeline_mode<synchronous>, transform_indices = @transform_5, window_bounds = array<i64: 1, 32>}, {pipeline_mode = #tpu.pipeline_mode<synchronous>, transform_indices = @transform_6, window_bounds = array<i64: 32, 4>}, {pipeline_mode = #tpu.pipeline_mode<synchronous>, transform_indices = @transform_7, window_bounds = array<i64: 4, 32>}, {transform_indices = @transform_8, window_bounds = array<i64: 2, 32>}]} {
    %c0 = arith.constant 0 : index
    %c0_0 = arith.constant 0 : index
    %0 = vector.load %arg1[%c0, %c0_0] : memref<16x32xf32, #tpu.memory_space<vmem>>, vector<16x32xf32>
    %c0_1 = arith.constant 0 : index
    %c0_2 = arith.constant 0 : index
    %1 = vector.load %arg3[%c0_1, %c0_2] : memref<32x32xf32, #tpu.memory_space<vmem>>, vector<32x32xf32>
    %cst = arith.constant dense<0.000000e+00> : vector<16x32xf32>
    %2 = tpu.matmul %0, %1, %cst {dimension_numbers = #tpu.dot_dimension_numbers<[1], [0], [0], [1], [0, 0, 1, 1], [], []>} : vector<16x32xf32>, vector<32x32xf32>, vector<16x32xf32> -> vector<16x32xf32>
    %c0_3 = arith.constant 0 : index
    %c0_4 = arith.constant 0 : index
    %3 = vector.load %arg4[%c0_3, %c0_4] : memref<32x32xf32, #tpu.memory_space<vmem>>, vector<32x32xf32>
    %cst_5 = arith.constant dense<0.000000e+00> : vector<16x32xf32>
    %4 = tpu.matmul %0, %3, %cst_5 {dimension_numbers = #tpu.dot_dimension_numbers<[1], [0], [0], [1], [0, 0, 1, 1], [], []>} : vector<16x32xf32>, vector<32x32xf32>, vector<16x32xf32> -> vector<16x32xf32>
    %c0_6 = arith.constant 0 : index
    %c0_7 = arith.constant 0 : index
    %5 = vector.load %arg2[%c0_6, %c0_7] : memref<2x32xf32, #tpu.memory_space<vmem>>, vector<2x32xf32>
    %6 = vector.shape_cast %2 : vector<16x32xf32> to vector<2x8x32xf32>
    %7 = vector.shape_cast %4 : vector<16x32xf32> to vector<2x8x32xf32>
    %8 = vector.shape_cast %5 : vector<2x32xf32> to vector<2x1x32xf32>
    %9 = vector.broadcast %8 : vector<2x1x32xf32> to vector<2x8x32xf32>
    %10 = arith.mulf %6, %9 : vector<2x8x32xf32>
    %11 = vector.shape_cast %10 : vector<2x8x32xf32> to vector<16x32xf32>
    %c0_8 = arith.constant 0 : index
    %c0_9 = arith.constant 0 : index
    %12 = vector.load %arg7[%c0_8, %c0_9] : memref<32x4xf32, #tpu.memory_space<vmem>>, vector<32x4xf32>
    %cst_10 = arith.constant dense<0.000000e+00> : vector<16x4xf32>
    %13 = tpu.matmul %11, %12, %cst_10 {dimension_numbers = #tpu.dot_dimension_numbers<[1], [0], [0], [1], [0, 0, 1, 1], [], []>} : vector<16x32xf32>, vector<32x4xf32>, vector<16x4xf32> -> vector<16x4xf32>
    %14 = vector.shape_cast %13 : vector<16x4xf32> to vector<2x8x4xf32>
    %cst_11 = arith.constant dense<0xFF800000> : vector<2x4xf32>
    %15 = vector.multi_reduction <maximumf>, %14, %cst_11 [1] : vector<2x8x4xf32> to vector<2x4xf32>
    %16 = vector.shape_cast %15 : vector<2x4xf32> to vector<2x1x4xf32>
    %17 = vector.broadcast %16 : vector<2x1x4xf32> to vector<2x8x4xf32>
    %18 = arith.subf %14, %17 : vector<2x8x4xf32>
    %19 = math.exp %18 : vector<2x8x4xf32>
    %cst_12 = arith.constant dense<0.000000e+00> : vector<2x4xf32>
    %20 = vector.multi_reduction <add>, %19, %cst_12 [1] : vector<2x8x4xf32> to vector<2x4xf32>
    %21 = vector.shape_cast %20 : vector<2x4xf32> to vector<2x1x4xf32>
    %22 = tpu.reciprocal %21 {approx = true} : vector<2x1x4xf32> -> vector<2x1x4xf32>
    %23 = vector.broadcast %22 : vector<2x1x4xf32> to vector<2x8x4xf32>
    %24 = arith.mulf %19, %23 : vector<2x8x4xf32>
    %25 = vector.shape_cast %24 : vector<2x8x4xf32> to vector<16x4xf32>
    %c0_13 = arith.constant 0 : index
    %c0_14 = arith.constant 0 : index
    %26 = vector.load %arg8[%c0_13, %c0_14] : memref<4x32xf32, #tpu.memory_space<vmem>>, vector<4x32xf32>
    %cst_15 = arith.constant dense<0.000000e+00> : vector<16x32xf32>
    %27 = tpu.matmul %25, %26, %cst_15 {dimension_numbers = #tpu.dot_dimension_numbers<[1], [0], [0], [1], [0, 0, 1, 1], [], []>} : vector<16x4xf32>, vector<4x32xf32>, vector<16x32xf32> -> vector<16x32xf32>
    %28 = vector.shape_cast %27 : vector<16x32xf32> to vector<2x8x32xf32>
    %29 = arith.mulf %28, %7 : vector<2x8x32xf32>
    %cst_16 = arith.constant dense<0.000000e+00> : vector<2x32xf32>
    %30 = vector.multi_reduction <add>, %29, %cst_16 [1] : vector<2x8x32xf32> to vector<2x32xf32>
    %c0_17 = arith.constant 0 : index
    %c0_18 = arith.constant 0 : index
    %31 = vector.load %arg5[%c0_17, %c0_18] : memref<32x32xf32, #tpu.memory_space<vmem>>, vector<32x32xf32>
    %cst_19 = arith.constant dense<0.000000e+00> : vector<2x32xf32>
    %32 = tpu.matmul %30, %31, %cst_19 {dimension_numbers = #tpu.dot_dimension_numbers<[1], [0], [0], [1], [0, 0, 1, 1], [], []>} : vector<2x32xf32>, vector<32x32xf32>, vector<2x32xf32> -> vector<2x32xf32>
    %c0_20 = arith.constant 0 : index
    %c0_21 = arith.constant 0 : index
    %33 = vector.load %arg6[%c0_20, %c0_21] : memref<1x32xf32, #tpu.memory_space<vmem>>, vector<1x32xf32>
    %34 = vector.broadcast %33 : vector<1x32xf32> to vector<2x32xf32>
    %35 = arith.addf %32, %34 : vector<2x32xf32>
    %c0_22 = arith.constant 0 : index
    %c0_23 = arith.constant 0 : index
    %36 = vector.load %arg9[%c0_22, %c0_23] : memref<2x32xf32, #tpu.memory_space<vmem>>, vector<2x32xf32>
    tpu.vector_store %arg9[%c0_22, %c0_23], %35 {strides = array<i32>} : memref<2x32xf32, #tpu.memory_space<vmem>>, vector<2x32xf32>,
    return
  }
  func.func @transform_0(%arg0: i32) -> (i32, i32) {
    %c0_i32 = arith.constant 0 : i32
    %c0_i32_0 = arith.constant 0 : i32
    return %arg0, %c0_i32 : i32, i32
  }
  func.func @transform_1(%arg0: i32) -> (i32, i32) {
    %c0_i32 = arith.constant 0 : i32
    %c0_i32_0 = arith.constant 0 : i32
    return %arg0, %c0_i32 : i32, i32
  }
  func.func @transform_2(%arg0: i32) -> (i32, i32) {
    %c0_i32 = arith.constant 0 : i32
    %c0_i32_0 = arith.constant 0 : i32
    %c0_i32_1 = arith.constant 0 : i32
    return %c0_i32, %c0_i32_0 : i32, i32
  }
  func.func @transform_3(%arg0: i32) -> (i32, i32) {
    %c0_i32 = arith.constant 0 : i32
    %c0_i32_0 = arith.constant 0 : i32
    %c0_i32_1 = arith.constant 0 : i32
    return %c0_i32, %c0_i32_0 : i32, i32
  }
  func.func @transform_4(%arg0: i32) -> (i32, i32) {
    %c0_i32 = arith.constant 0 : i32
    %c0_i32_0 = arith.constant 0 : i32
    %c0_i32_1 = arith.constant 0 : i32
    return %c0_i32, %c0_i32_0 : i32, i32
  }
  func.func @transform_5(%arg0: i32) -> (i32, i32) {
    %c0_i32 = arith.constant 0 : i32
    %c0_i32_0 = arith.constant 0 : i32
    %c0_i32_1 = arith.constant 0 : i32
    return %c0_i32, %c0_i32_0 : i32, i32
  }
  func.func @transform_6(%arg0: i32) -> (i32, i32) {
    %c0_i32 = arith.constant 0 : i32
    %c0_i32_0 = arith.constant 0 : i32
    %c0_i32_1 = arith.constant 0 : i32
    return %c0_i32, %c0_i32_0 : i32, i32
  }
  func.func @transform_7(%arg0: i32) -> (i32, i32) {
    %c0_i32 = arith.constant 0 : i32
    %c0_i32_0 = arith.constant 0 : i32
    %c0_i32_1 = arith.constant 0 : i32
    return %c0_i32, %c0_i32_0 : i32, i32
  }
  func.func @transform_8(%arg0: i32) -> (i32, i32) {
    %c0_i32 = arith.constant 0 : i32
    %c0_i32_0 = arith.constant 0 : i32
    return %arg0, %c0_i32 : i32, i32
  }
}

</mosaic_0001>

<bundles_post_ra>
// kernel: tpu_custom_call.1
= control target key start
LH: loop header
LB: loop body
LE: loop exit
PB: predicated region body
PF: predicated region fallthrough
CT: control target
= control target key end

     0   :  { %13 = vsyncpa [#allocation3], 0  ;;  %s909_s0 = inlined_call_operand.hbm [shape: f32[16,32], index: 0, kind: input, shape index: {}]   ;;  %s910_s1 = inlined_call_operand.vmem [shape: f32[2,32], index: 1, kind: input, shape index: {}]   ;;  %s911_s2 = inlined_call_operand.vmem [shape: f32[32,32], index: 2, kind: input, shape index: {}]   ;;  %s912_s3 = inlined_call_operand.hbm [shape: f32[32,32], index: 3, kind: input, shape index: {}]   ;;  %s913_s4 = inlined_call_operand.hbm [shape: f32[32,32], index: 4, kind: input, shape index: {}]   ;;  %s914_s5 = inlined_call_operand.vmem [shape: f32[1,32], index: 5, kind: input, shape index: {}]   ;;  %s915_s6 = inlined_call_operand.vmem [shape: f32[32,4], index: 6, kind: input, shape index: {}]   ;;  %s916_s7 = inlined_call_operand.vmem [shape: f32[4,32], index: 7, kind: input, shape index: {}]   ;;  %s917_s8 = inlined_call_operand.hbm [shape: f32[2,32], index: 8, kind: output, shape index: {}]  }
   0x1   :  { %14 = vsyncpa [#allocation6], 0 }
   0x2   :  { %15 = vsyncpa [#allocation4], 0  ;;  %s795_s27 = smov [#allocation5]   ;;  %s796_s29 = smov [#allocation2]  }
   0x3   :  { %s37_s28 = sshll.u32 %s795_s27, 4  ;;  %s21_s30 = sshll.u32 %s796_s29, 4  ;;  %s38_s28 = int_to_ptr.vmem [resolvable:$true] %s37_s28  ;;  %s22_s30 = int_to_ptr.vmem [resolvable:$true] %s21_s30 }
   0x4   :  { %s717_s9 = scalar_lea.vmem %s38_s28, 512  ;;  %p722_p1 = scmp.lt.s32.totalorder %s38_s28, %s38_s28 }
   0x5   :  { %p718_p0 = scmp.ne.s32.totalorder %s38_s28, %s717_s9  ;;  %p723_p2 = scmp.lt.s32.totalorder %s717_s9, %s717_s9 }
   0x7   :  { %p724_p3 = por %p723_p2, %p722_p1 }
   0x9   :  { %p725_p4 = pnand %p724_p3, %p718_p0 }
   0xb   :  { %728 = shalt.err (!%p725_p4)
}
   0xc   :  { %s797_s10 = smov 128   ;;  %s798_s11 = smov 8  }
   0xd   :  { %43 = dma.hbm_to_vmem [thread:$0]  %s912_s3, 512, %s38_s28, [#allocation6], %s797_s10, %s797_s10, %s798_s11  }
   0xe   :  { %s737_s14 = scalar_lea.vmem %s22_s30, 256  ;;  %p742_p6 = scmp.lt.s32.totalorder %s22_s30, %s22_s30 }
   0xf   :  { %p738_p5 = scmp.ne.s32.totalorder %s22_s30, %s737_s14  ;;  %p743_p7 = scmp.lt.s32.totalorder %s737_s14, %s737_s14 }
  0x11   :  { %p744_p8 = por %p743_p7, %p742_p6 }
  0x13   :  { %p745_p9 = pnand %p744_p8, %p738_p5 }
  0x15   :  { %748 = shalt.err (!%p745_p9)
}
  0x16   :  { %27 = dma.hbm_to_vmem [thread:$0]  %s909_s0, 256, %s22_s30, [#allocation3], %s797_s10, %s797_s10, %s798_s11  }
  0x17   :  { %s799_s17 = smov [#allocation7]  }
  0x18   :  { %s49_s18 = sshll.u32 %s799_s17, 4  ;;  %s50_s18 = int_to_ptr.vmem [resolvable:$true] %s49_s18 }
  0x19   :  { %s757_s19 = scalar_lea.vmem %s50_s18, 512  ;;  %p762_p11 = scmp.lt.s32.totalorder %s50_s18, %s50_s18 }
  0x1a   :  { %p758_p10 = scmp.ne.s32.totalorder %s50_s18, %s757_s19  ;;  %p763_p12 = scmp.lt.s32.totalorder %s757_s19, %s757_s19 }
  0x1c   :  { %p764_p13 = por %p763_p12, %p762_p11 }
  0x1e   :  { %p765_p0 = pnand %p764_p13, %p758_p10 }
  0x20   :  { %768 = shalt.err (!%p765_p0)
}
  0x21   :  { %55 = dma.hbm_to_vmem [thread:$0]  %s913_s4, 512, %s50_s18, [#allocation6], %s797_s10, %s797_s10, %s798_s11  }
  0x22   :  { %789 = dma.done.wait [#allocation3], 256  }
  0x23   :  { %790 = vsyncadd [#allocation3], 4294967040 }
  0x24   :  { %791 = dma.done.wait [#allocation6], 1024  }
  0x25   :  { %792 = vsyncadd [#allocation6], 4294966272  ;;  %vm77_vm0 = vcmask 261120   ;;  %v76_v0 = vld [vmem:[%s911_s2 + $0x18] sm:$0xff]  ;;  %v75_v1 = vld [vmem:[%s911_s2 + $0x10] sm:$0xff]  ;;  %v251_v12 = vlaneseq  ;;  %vm405_vm1 = vcmask 1043456  }
  0x26   :  { %643 = vmatprep.subr.mxu0 %v76_v0  ;;  %v71_v2 = vld [vmem:[#allocation2] sm:$0xff]  ;;  %v74_v3 = vld [vmem:[%s911_s2 + $0x8] sm:$0xff]  ;;  %v277_v6 = vld [vmem:[%s915_s6 + $0x18] sm:$0xff]  ;;  %v800_v10 = vmov 1966171168   ;;  %vm359_vm2 = vcmask 31744  }
  0x27   :  { %644 = vmatpush3.msra.mxu0 %v76_v0  ;;  %651 = vmatprep.mubr.msk.f32.mxu0 %vm77_vm0, %v71_v2  ;;  %v73_v4 = vld [vmem:[%s911_s2] sm:$0xff]  ;;  %v72_v5 = vld [vmem:[#allocation2 + $0x8] sm:$0xff]  ;;  %v276_v7 = vld [vmem:[%s915_s6 + $0x10] sm:$0xff]  ;;  %v249_v11 = vunpack.c.l.s4 %v800_v10  ;;  %v252_v14 = vshrl.u32 %v251_v12, 7  ;;  %vm802_vm3 = vmmov 0   ;;  %vm513_vm4 = vcmask 1041409  }
  0x28   :  { %645 = vmatprep.subr.mxu0 %v75_v1  ;;  %662 = vmatprep.mubr.msk.f32.mxu1 %vm77_vm0, %v71_v2  ;;  %v275_v8 = vld [vmem:[%s915_s6 + $0x8] sm:$0xff]  ;;  %v274_v9 = vld [vmem:[%s915_s6] sm:$0xff]  ;;  %v160_v29 = vld [vmem:[#allocation5 + $0x8] sm:$0xff]  ;;  %s803_s15 = smov [#allocation8]   ;;  %vm587_vm5 = vcmask 254976  }
  0x29   :  { %646 = vmatpush3.msra.mxu0 %v75_v1  ;;  %v250_v13 = vunpack.c.0.s8 %v249_v11  ;;  %v609_v15 = vld.sshfl [vmem:[%s910_s1] sm:$0x11 pattern:$0x75316420]  ;;  %v264_v20 = vsub.s32 0, %v252_v14  ;;  %v162_v27 = vld [vmem:[#allocation5 + $0x18] sm:$0xff] }
  0x2a   :  { %647 = vmatprep.subr.mxu0 %v74_v3  ;;  %v247_v16 = vcombine.high %v609_v15, %v609_v15  ;;  %v161_v28 = vld [vmem:[#allocation5 + $0x10] sm:$0xff]  ;;  %654 = vmatprep.subr.mxu1 %v162_v27  ;;  %v159_v30 = vld [vmem:[#allocation5] sm:$0xff]  ;;  %v501_v11 = vld [vmem:[#allocation7 + $0x8] sm:$0xff]  ;;  %s595_s16 = sshll.u32 %s803_s15, 4  ;;  %s596_s16 = int_to_ptr.vmem [resolvable:$true] %s595_s16 }
  0x2b   :  { %648 = vmatpush3.msra.mxu0 %v74_v3  ;;  %v253_v17 = vsub.s32 %v250_v13, %v252_v14  ;;  %655 = vmatpush3.msra.mxu1 %v162_v27  ;;  %v398_v31 = vld [vmem:[%s916_s7] sm:$0xf]  ;;  %v500_v12 = vld [vmem:[#allocation7] sm:$0xff]  ;;  %s769_s17 = scalar_lea.vmem %s596_s16, 32  ;;  %p774_p2 = scmp.lt.s32.totalorder %s596_s16, %s596_s16 }
  0x2c   :  { %649 = vmatprep.subr.mxu0 %v73_v4  ;;  %656 = vmatprep.subr.mxu1 %v161_v28  ;;  %v502_v10 = vld [vmem:[#allocation7 + $0x10] sm:$0xff]  ;;  %p770_p1 = scmp.ne.s32.totalorder %s596_s16, %s769_s17  ;;  %p775_p3 = scmp.lt.s32.totalorder %s769_s17, %s769_s17 }
  0x2d   :  { %650 = vmatpush3.msra.mxu0 %v73_v4  ;;  %v254_v18 = vrot.slane %v609_v15, %v253_v17  ;;  %v261_v19 = vrot.slane %v247_v16, %v253_v17  ;;  %657 = vmatpush3.msra.mxu1 %v161_v28 }
  0x2e   :  { %652 = vmatmul.mubr.msk.f32.vlgmr.msra.gmra.mxu0 %vm77_vm0, %v72_v5  ;;  %665 = vmatprep.subr.mxu0 %v277_v6  ;;  %p776_p4 = por %p775_p3, %p774_p2 }
  0x2f   :  { %666 = vmatpush3.msra.mxu0 %v277_v6  ;;  %v265_v21 = vrot.slane %v254_v18, %v264_v20  ;;  %v269_v23 = vrot.slane %v261_v19, %v264_v20  ;;  %658 = vmatprep.subr.mxu1 %v160_v29 }
  0x30   :  { %667 = vmatprep.subr.mxu0 %v276_v7  ;;  %659 = vmatpush3.msra.mxu1 %v160_v29  ;;  %p777_p5 = pnand %p776_p4, %p770_p1 }
  0x31   :  { %668 = vmatpush3.msra.mxu0 %v276_v7  ;;  %660 = vmatprep.subr.mxu1 %v159_v30 }
  0x32   :  { %669 = vmatprep.subr.mxu0 %v275_v8  ;;  %661 = vmatpush3.msra.mxu1 %v159_v30 }
  0x33   :  { %670 = vmatpush3.msra.mxu0 %v275_v8  ;;  %663 = vmatmul.mubr.msk.f32.vlgmr.msra.gmra.mxu1 %vm77_vm0, %v72_v5  ;;  %v801_v8 = vmov 0.0  }
  0x34   :  { %671 = vmatprep.subr.mxu0 %v274_v9  ;;  %676 = vmatprep.subr.msk.mxu1 %vm405_vm1, %v398_v31 }
  0x35   :  { %672 = vmatpush3.msra.mxu0 %v274_v9  ;;  %677 = vmatpush3.msk.msra.mxu1 %vm405_vm1, %v398_v31  ;;  %v503_v9 = vld [vmem:[#allocation7 + $0x18] sm:$0xff] }
  0x36   :  { %681 = vmatprep.subr.mxu1 %v801_v8 }
  0xee   :  { %v653_v22 = vpop.f32.mrf.mxu0 }
  0xef   :  { %v273_v26 = vmul.f32 %v653_v22, %v269_v23 }
  0xf0   :  { %v150_v24 = vpop.f32.mrf.mxu0 }
  0xf1   :  { %v272_v25 = vmul.f32 %v265_v21, %v150_v24 }
  0xf3   :  { %673 = vmatprep.mubr.msk.f32.mxu0 %vm77_vm0, %v272_v25  ;;  %v664_v13 = vpop.f32.mrf.mxu1 }
  0xf4   :  { %674 = vmatmul.mubr.msk.f32.vlgmr.msra.gmra.mxu0 %vm77_vm0, %v273_v26 }
  0xf5   :  { %v229_v14 = vpop.f32.mrf.mxu1 }
 0x1b4   :  { %v675_v32 = vpop.f32.mrf.mxu0 }
 0x1b5   :  { %v367_v33 = vsel %vm359_vm2, %v675_v32, -inf }
 0x1b6   :  { %v368_v34 = vrot.slane %v367_v33, 4  ;;  %v350_v35 = vpop.f32.mrf.mxu0 }
 0x1b7   :  { %v360_v36 = vsel %vm359_vm2, %v350_v35, -inf }
 0x1b8   :  { %v369_v37 = vmax.f32 %v367_v33, %v368_v34  ;;  %v361_v38 = vrot.slane %v360_v36, 4  ;;  %v615_v34 = vld [vmem:[%s914_s5] ss:$0 sm:$0xff] }
 0x1ba   :  { %v370_v39 = vrot.slane %v369_v37, 2  ;;  %v362_v40 = vmax.f32 %v360_v36, %v361_v38 }
 0x1bc   :  { %v371_v41 = vmax.f32 %v369_v37, %v370_v39  ;;  %v363_v42 = vrot.slane %v362_v40, 2 }
 0x1be   :  { %v372_v43 = vrot.slane %v371_v41, 1  ;;  %v364_v44 = vmax.f32 %v362_v40, %v363_v42 }
 0x1c0   :  { %v373_v45 = vmax.f32 %v371_v41, %v372_v43  ;;  %v365_v46 = vrot.slane %v364_v44, 1 }
 0x1c2   :  { %v375_v47 = vsub.f32 %v675_v32, %v373_v45  ;;  %v366_v48 = vmax.f32 %v364_v44, %v365_v46 }
 0x1c4   :  { %v378_v49 = vmul.f32 1.442695, %v375_v47  ;;  %v374_v50 = vsub.f32 %v350_v35, %v366_v48 }
 0x1c6   :  { %701 = vpow2.f32 %v378_v49  ;;  %v376_v51 = vmul.f32 1.442695, %v374_v50 }
 0x1c8   :  { %703 = vpow2.f32 %v376_v51 }
 0x1d3   :  { %v702_v52 = vpop.eup %701 }
 0x1d4   :  { %v387_v53 = vsel %vm359_vm2, %v702_v52, 0.0 }
 0x1d5   :  { %v704_v54 = vpop.eup %703  ;;  %v388_v55 = vrot.slane %v387_v53, 4 }
 0x1d6   :  { %v380_v56 = vsel %vm359_vm2, %v704_v54, 0.0 }
 0x1d7   :  { %v389_v57 = vadd.f32 %v388_v55, %v387_v53  ;;  %v381_v58 = vrot.slane %v380_v56, 4 }
 0x1d9   :  { %v390_v59 = vrot.slane %v389_v57, 2  ;;  %v382_v60 = vadd.f32 %v381_v58, %v380_v56 }
 0x1db   :  { %v391_v61 = vadd.f32 %v390_v59, %v389_v57  ;;  %v383_v62 = vrot.slane %v382_v60, 2 }
 0x1dd   :  { %v392_v63 = vrot.slane %v391_v61, 1  ;;  %v384_v0 = vadd.f32 %v383_v62, %v382_v60 }
 0x1df   :  { %v393_v1 = vadd.f32 %v392_v63, %v391_v61  ;;  %v385_v2 = vrot.slane %v384_v0, 1 }
 0x1e1   :  { %v386_v3 = vadd.f32 %v385_v2, %v384_v0  ;;  %705 = vrcp.f32 %v393_v1 }
 0x1e3   :  { %707 = vrcp.f32 %v386_v3 }
 0x1ee   :  { %v706_v4 = vpop.eup %705 }
 0x1ef   :  { %v397_v7 = vmul.f32 %v706_v4, %v702_v52 }
 0x1f0   :  { %v708_v5 = vpop.eup %707 }
 0x1f1   :  { %v396_v6 = vmul.f32 %v708_v5, %v704_v54 }
 0x1f3   :  { %678 = vmatprep.mubr.msk.f32.mxu1 %vm359_vm2, %v396_v6 }
 0x1f4   :  { %679 = vmatmul.mubr.msk.f32.vlgmr.msra.gmra.mxu1 %vm359_vm2, %v397_v7 }
 0x1f5   :  { %682 = vmatpush3.msra.mxu1 %v503_v9  ;;  %689 = vmatprep.mubr.msk.f32.mxu1 %vm802_vm3, %v801_v8 }
 0x1f6   :  { %683 = vmatprep.subr.mxu1 %v801_v8 }
 0x1f7   :  { %684 = vmatpush3.msra.mxu1 %v502_v10 }
 0x1f8   :  { %685 = vmatprep.subr.mxu1 %v801_v8 }
 0x1f9   :  { %686 = vmatpush3.msra.mxu1 %v501_v11 }
 0x1fa   :  { %687 = vmatprep.subr.mxu1 %v801_v8 }
 0x1fb   :  { %688 = vmatpush3.msra.mxu1 %v500_v12 }
 0x2b4   :  { %v680_v15 = vpop.f32.mrf.mxu1 }
 0x2b5   :  { %v485_v16 = vmul.f32 %v680_v15, %v664_v13 }
 0x2b6   :  { %v475_v17 = vpop.f32.mrf.mxu1 }
 0x2b7   :  { %v493_v18 = vsel %vm77_vm0, %v485_v16, 0.0  ;;  %v484_v19 = vmul.f32 %v475_v17, %v229_v14 }
 0x2b8   :  { %v494_v20 = vrot.slane %v493_v18, 4 }
 0x2b9   :  { %v486_v21 = vsel %vm77_vm0, %v484_v19, 0.0 }
 0x2ba   :  { %v495_v22 = vadd.f32 %v494_v20, %v493_v18  ;;  %v487_v23 = vrot.slane %v486_v21, 4 }
 0x2bc   :  { %v496_v24 = vrot.slane %v495_v22, 2  ;;  %v488_v25 = vadd.f32 %v487_v23, %v486_v21 }
 0x2be   :  { %v497_v26 = vadd.f32 %v496_v24, %v495_v22  ;;  %v489_v27 = vrot.slane %v488_v25, 2 }
 0x2c0   :  { %v498_v28 = vrot.slane %v497_v26, 1  ;;  %v490_v29 = vadd.f32 %v489_v27, %v488_v25 }
 0x2c2   :  { %v491_v30 = vrot.slane %v490_v29, 1  ;;  %v499_v31 = vadd.f32 %v498_v28, %v497_v26 }
 0x2c4   :  { %v492_v32 = vadd.f32 %v491_v30, %v490_v29 }
 0x2c6   :  { %v514_v33 = vsel %vm513_vm4, %v499_v31, %v492_v32 }
 0x2c7   :  { %690 = vmatmul.mubr.msk.f32.vlgmr.msra.gmra.mxu1 %vm77_vm0, %v514_v33 }
 0x387   :  { %v583_v35 = vpop.f32.mrf.mxu1 }
 0x388   :  { %v584_v36 = vadd.f32 %v615_v34, %v583_v35 }
 0x389   :  { %v691_v37 = vpop.f32.mrf.mxu1 }
 0x38a   :  { %588 = vst.msk [vmem:[#allocation8] sm:$0x3] %vm587_vm5, %v584_v36 }
 0x38b   :  { %780 = shalt.err (!%p777_p5)
}
 0x38c   :  { %598 = dma.vmem_to_hbm [thread:$0]  %s596_s16, 32, %s917_s8, [#allocation4]  }
 0x38d   :  { %793 = dma.done.wait [#allocation4], 32  }
 0x38e   :  { %794 = vsyncadd [#allocation4], 4294967264 }
 0x38f   :  { %602 = vsyncpa [#allocation3], 1 }
 0x390   :  { %603 = vsyncpa [#allocation6], 1 }
 0x391   :  { %604 = vsyncpa [#allocation4], 1 }

</bundles_post_ra>
